<compile_context>
chip_gen: v5e
topology: v5e:2x2
jax: 0.10.0
libtpu: 0.0.40
codegen_flags: <defaults>
</compile_context>

<pallas_src>
import functools

import jax
import jax.numpy as jnp
import numpy as np
from jax import lax
from jax.experimental import pallas as pl
from jax.experimental.pallas import tpu as pltpu


def _refine_kernel(mask_ref, x_ref, w_ref, o_ref, *, width):
    # mask_ref: (10R, HW) f32  per-tap 0/1 validity masks pre-broadcast to all
    #                          R = N*C rows (tap-major); last R rows are all-ones
    #                          (bias block).
    # x_ref:    (R, HW)        batch*channels on sublanes, H*W flattened on lanes.
    # w_ref:    (R, 10R) f32   block-diagonal BN-scale-folded conv weights (9 tap
    #                          blocks) + folded BN shift in the trailing R columns.
    # o_ref:    (R, HW)
    R, HW = x_ref.shape
    x = x_ref[...].astype(jnp.float32)          # upcast in vregs (bf16-friendly)

    # Build the 9 shifted taps with lane rotations (XLU slot, cheap).  Wrapped
    # positions are exactly the ones the precomputed masks zero out.
    taps = []
    for dy in range(3):
        for dx in range(3):
            s = (dy - 1) * width + (dx - 1)     # flat source offset for this tap
            if s == 0:
                taps.append(x)                  # centre tap: no shift needed
            else:
                taps.append(pltpu.roll(x, shift=(-s) % HW, axis=1))
    taps.append(jnp.ones((R, HW), jnp.float32))  # bias rows (BN shift)

    stacked = jnp.concatenate(taps, axis=0)     # (10R, HW), 8-row aligned chunks
    stacked = stacked * mask_ref[...]           # zero-padding emulation, full vregs

    # Single MXU matmul does all Cout x Cin x 9 taps + the BN shift at once.
    y = jnp.dot(w_ref[...], stacked, preferred_element_type=jnp.float32)  # (R, HW)
    o_ref[...] = jnp.maximum(y, 0.0).astype(o_ref.dtype)                  # ReLU


def _feature_refinement(x_nchw, weight_oihw, gamma, beta, running_mean,
                        running_var, eps=1e-5):
    """Equivalent of F.relu(bn(conv(x))) with BatchNorm in eval mode."""
    N, C, H, W = x_nchw.shape
    HW = H * W
    R = N * C

    # Fold the BN scale into the conv weights; the shift becomes bias columns.
    scale = (gamma / jnp.sqrt(running_var + eps)).astype(jnp.float32)        # (C,)
    shift = (beta - running_mean * scale).astype(jnp.float32)                # (C,)
    w_scaled = weight_oihw.astype(jnp.float32) * scale.reshape(C, 1, 1, 1)   # (C,C,3,3)

    # Block-diagonal weight: row n*C+co, col t*R + n*C + ci  ->  w_scaled[co,ci,dy,dx]
    # (t = dy*3+dx).  Trailing R columns carry the folded BN shift (bias block).
    eye_n = jnp.eye(N, dtype=jnp.float32)
    blocks = [jnp.kron(eye_n, w_scaled[:, :, dy, dx])
              for dy in range(3) for dx in range(3)]
    blocks.append(jnp.diag(jnp.tile(shift, N)))                              # (R, R)
    w_big = jnp.concatenate(blocks, axis=1)                                  # (R, 10R)

    # Per-tap zero-padding masks, pre-broadcast to all R rows (tap-major), plus
    # an all-ones block that keeps the in-kernel bias rows intact.
    hh = np.arange(H).reshape(H, 1)
    ww = np.arange(W).reshape(1, W)
    masks = []
    for dy in range(3):
        for dx in range(3):
            oy, ox = dy - 1, dx - 1
            valid = ((hh + oy >= 0) & (hh + oy < H) &
                     (ww + ox >= 0) & (ww + ox < W))
            masks.append(valid.reshape(HW).astype(np.float32))
    mask_np = np.repeat(np.stack(masks), R, axis=0)                          # (9R, HW)
    mask_np = np.concatenate([mask_np, np.ones((R, HW), np.float32)], axis=0)
    mask_big = jnp.asarray(mask_np)                                          # (10R, HW)

    # N*C onto sublanes, H*W onto lanes: a free reshape (no transpose, no pad).
    x_flat = x_nchw.reshape(R, HW)

    kernel = functools.partial(_refine_kernel, width=W)
    out_flat = pl.pallas_call(
        kernel,
        out_shape=jax.ShapeDtypeStruct((R, HW), x_nchw.dtype),
        # Single invocation, whole problem resident in VMEM: at these shapes the
        # per-grid-step pipeline overhead would dominate, so no grid at all.
        in_specs=[
            pl.BlockSpec(memory_space=pltpu.MemorySpace.VMEM),  # masks   (10R, HW)
            pl.BlockSpec(memory_space=pltpu.MemorySpace.VMEM),  # x       (R, HW)
            pl.BlockSpec(memory_space=pltpu.MemorySpace.VMEM),  # weights (R, 10R)
        ],
        out_specs=pl.BlockSpec(memory_space=pltpu.MemorySpace.VMEM),
    )(mask_big, x_flat, w_big)

    return out_flat.reshape(N, C, H, W)


feature_refinement = jax.jit(_feature_refinement)


def _reference(x_nchw, weight_oihw, gamma, beta, running_mean, running_var,
               eps=1e-5):
    y = lax.conv_general_dilated(
        x_nchw, weight_oihw, window_strides=(1, 1), padding=((1, 1), (1, 1)),
        dimension_numbers=("NCHW", "OIHW", "NCHW"))
    scale = (gamma / jnp.sqrt(running_var + eps)).reshape(1, -1, 1, 1)
    shift = (beta - running_mean * gamma / jnp.sqrt(running_var + eps)
             ).reshape(1, -1, 1, 1)
    return jnp.maximum(y * scale + shift, 0.0)


if __name__ == "__main__":
    key = jax.random.PRNGKey(0)
    k_x, k_w, k_g, k_b, k_m, k_v = jax.random.split(key, 6)

    N, C, H, W = 2, 4, 16, 16

    x = jax.random.normal(k_x, (N, C, H, W), jnp.float32)
    # Deterministic synthetic parameters (no checkpoint loading).
    weight = jax.random.normal(k_w, (C, C, 3, 3), jnp.float32) * 0.1
    gamma = 1.0 + 0.1 * jax.random.normal(k_g, (C,), jnp.float32)
    beta = 0.1 * jax.random.normal(k_b, (C,), jnp.float32)
    running_mean = 0.1 * jax.random.normal(k_m, (C,), jnp.float32)
    running_var = jnp.abs(jax.random.normal(k_v, (C,), jnp.float32)) + 0.5

    out = feature_refinement(x, weight, gamma, beta, running_mean, running_var)
    out = jax.block_until_ready(out)

    ref = _reference(x, weight, gamma, beta, running_mean, running_var)
    assert out.shape == (N, C, H, W)
    assert jnp.allclose(out, ref, atol=1e-4, rtol=1e-4), float(
        jnp.max(jnp.abs(out - ref)))

    print("KERNEL_OK")
</pallas_src>

<mosaic_0001>
module attributes {stable_mosaic.version = 11 : i64} {
  func.func @_refine_kernel(%arg0: memref<80x256xf32, #tpu.memory_space<vmem>>, %arg1: memref<8x256xf32, #tpu.memory_space<vmem>>, %arg2: memref<8x80xf32, #tpu.memory_space<vmem>>, %arg3: memref<8x256xf32, #tpu.memory_space<vmem>>) attributes {dimension_semantics = [], scalar_prefetch = 0 : i64, scratch_operands = 0 : i64, tpu.core_type = #tpu.core_type<tc>} {
    %c0 = arith.constant 0 : index
    %c0_0 = arith.constant 0 : index
    %0 = vector.load %arg1[%c0, %c0_0] : memref<8x256xf32, #tpu.memory_space<vmem>>, vector<8x256xf32>
    %c17_i32 = arith.constant 17 : i32
    %1 = tpu.dynamic_rotate %0 by %c17_i32 dim 1 : vector<8x256xf32>, i32 -> vector<8x256xf32>
    %c16_i32 = arith.constant 16 : i32
    %2 = tpu.dynamic_rotate %0 by %c16_i32 dim 1 : vector<8x256xf32>, i32 -> vector<8x256xf32>
    %c15_i32 = arith.constant 15 : i32
    %3 = tpu.dynamic_rotate %0 by %c15_i32 dim 1 : vector<8x256xf32>, i32 -> vector<8x256xf32>
    %c1_i32 = arith.constant 1 : i32
    %4 = tpu.dynamic_rotate %0 by %c1_i32 dim 1 : vector<8x256xf32>, i32 -> vector<8x256xf32>
    %c255_i32 = arith.constant 255 : i32
    %5 = tpu.dynamic_rotate %0 by %c255_i32 dim 1 : vector<8x256xf32>, i32 -> vector<8x256xf32>
    %c241_i32 = arith.constant 241 : i32
    %6 = tpu.dynamic_rotate %0 by %c241_i32 dim 1 : vector<8x256xf32>, i32 -> vector<8x256xf32>
    %c240_i32 = arith.constant 240 : i32
    %7 = tpu.dynamic_rotate %0 by %c240_i32 dim 1 : vector<8x256xf32>, i32 -> vector<8x256xf32>
    %c239_i32 = arith.constant 239 : i32
    %8 = tpu.dynamic_rotate %0 by %c239_i32 dim 1 : vector<8x256xf32>, i32 -> vector<8x256xf32>
    %cst = arith.constant 1.000000e+00 : f32
    %9 = vector.broadcast %cst : f32 to vector<8x256xf32>
    %10 = tpu.concatenate %1, %2, %3, %4, %0, %5, %6, %7, %8, %9 in 0 : vector<8x256xf32>, vector<8x256xf32>, vector<8x256xf32>, vector<8x256xf32>, vector<8x256xf32>, vector<8x256xf32>, vector<8x256xf32>, vector<8x256xf32>, vector<8x256xf32>, vector<8x256xf32> -> vector<80x256xf32>
    %c0_1 = arith.constant 0 : index
    %c0_2 = arith.constant 0 : index
    %11 = vector.load %arg0[%c0_1, %c0_2] : memref<80x256xf32, #tpu.memory_space<vmem>>, vector<80x256xf32>
    %12 = arith.mulf %10, %11 : vector<80x256xf32>
    %c0_3 = arith.constant 0 : index
    %c0_4 = arith.constant 0 : index
    %13 = vector.load %arg2[%c0_3, %c0_4] : memref<8x80xf32, #tpu.memory_space<vmem>>, vector<8x80xf32>
    %cst_5 = arith.constant dense<0.000000e+00> : vector<8x256xf32>
    %14 = tpu.matmul %13, %12, %cst_5 {dimension_numbers = #tpu.dot_dimension_numbers<[1], [0], [0], [1], [0, 0, 1, 1], [], []>} : vector<8x80xf32>, vector<80x256xf32>, vector<8x256xf32> -> vector<8x256xf32>
    %cst_6 = arith.constant 0.000000e+00 : f32
    %15 = vector.broadcast %cst_6 : f32 to vector<8x256xf32>
    %16 = arith.maximumf %14, %15 : vector<8x256xf32>
    %c0_7 = arith.constant 0 : index
    %c0_8 = arith.constant 0 : index
    %17 = vector.load %arg3[%c0_7, %c0_8] : memref<8x256xf32, #tpu.memory_space<vmem>>, vector<8x256xf32>
    tpu.vector_store %arg3[%c0_7, %c0_8], %16 {strides = array<i32>} : memref<8x256xf32, #tpu.memory_space<vmem>>, vector<8x256xf32>,
    return
  }
}

</mosaic_0001>

<bundles_post_ra>
// kernel: tile.8
= control target key start
LH: loop header
LB: loop body
LE: loop exit
PB: predicated region body
PF: predicated region fallthrough
CT: control target
= control target key end

     0   :  { %s22_s0 = inlined_call_operand.vmem [shape: f32[4], index: 0, kind: input, shape index: {}]   ;;  %s23_s1 = inlined_call_operand.vmem [shape: f32[2,4], index: 1, kind: output, shape index: {}]  }
   0x1   :  { %v4_v0 = vld [vmem:[%s22_s0] ss:$0 sm:$0xff] }
   0x2   :  { %5 = vst [vmem:[%s23_s1] sm:$0x3] %v4_v0 }

// kernel: tile.9
= control target key start
LH: loop header
LB: loop body
LE: loop exit
PB: predicated region body
PF: predicated region fallthrough
CT: control target
= control target key end

     0   :  { %vm7_vm0 = vcmask 31744   ;;  %vm13_vm1 = vcmask 64544   ;;  %s39_s0 = inlined_call_operand.vmem [shape: f32[2,4], index: 0, kind: input, shape index: {}]   ;;  %s40_s1 = inlined_call_operand.vmem [shape: f32[8], index: 1, kind: output, shape index: {}]  }
   0x1   :  { %v4_v0 = vld [vmem:[%s39_s0] sm:$0x3]  ;;  %s22_s0 = smov 4  }
   0x2   :  { %5 = vst [vmem:[#allocation1] sm:$0x3] %v4_v0 }
   0x9   :  { %v10_v1 = vld [vmem:[#allocation1 + $0x1] sm:$0x1]   ;;  %v6_v2 = vld [vmem:[#allocation1] sm:$0x1]  }
   0xa   :  { %11 = vrot.lane.b32.xlu0 %v10_v1, %s22_s0  ;;  %8 = vst.msk [vmem:[#allocation0] sm:$0x1] %vm7_vm0, %v6_v2  }
  0x7c   :  { %v12_v3 = vpop.permute.xlu0 %11  }
  0x7d   :  { %14 = vst.msk [vmem:[#allocation0] sm:$0x1] %vm13_vm1, %v12_v3  }
  0x84   :  { %v17_v4 = vld [vmem:[#allocation0] sm:$0x1] }
  0x85   :  { %20 = vst [vmem:[%s40_s1] sm:$0x1] %v17_v4 }

// kernel: _feature_refinement.1
= control target key start
LH: loop header
LB: loop body
LE: loop exit
PB: predicated region body
PF: predicated region fallthrough
CT: control target
= control target key end

     0   :  { %s175_s14 = smov 112   ;;  %s176_s15 = smov 111   ;;  %v20_v5 = vlaneseq  ;;  %vm113_vm8 = vcmask 654336   ;;  %s310_s1 = inlined_call_operand.vmem [shape: f32[8,256], index: 1, kind: input, shape index: {}]   ;;  %s311_s0 = inlined_call_operand.vmem [shape: f32[80,256], index: 0, kind: input, shape index: {}]   ;;  %s312_s2 = inlined_call_operand.vmem [shape: f32[8,80], index: 2, kind: input, shape index: {}]   ;;  %s313_s3 = inlined_call_operand.vmem [shape: f32[8,256], index: 3, kind: output, shape index: {}]  }
   0x1   :  { %v206_v0 = vld [vmem:[%s310_s1] sm:$0xff]  ;;  %s177_s16 = smov 113   ;;  %v214_v1 = vld [vmem:[%s310_s1 + $0x8] sm:$0xff]  ;;  %s178_s19 = smov 127   ;;  %v92_v2 = vld [vmem:[%s311_s0 + $0x90] sm:$0xff] }
   0x2   :  { %60 = vrot.lane.b32.xlu1 %v206_v0, %s175_s14  ;;  %67 = vrot.lane.b32.xlu0 %v206_v0, %s176_s15  ;;  %s179_s20 = smov 1   ;;  %s180_s21 = smov 15   ;;  %v93_v3 = vld [vmem:[%s311_s0 + $0x98] sm:$0xff]  ;;  %v235_v8 = vand.u32 127, %v20_v5  ;;  %v90_v10 = vld [vmem:[%s311_s0 + $0x80] sm:$0xff] }
   0x3   :  { %53 = vrot.lane.b32.xlu2 %v206_v0, %s177_s16  ;;  %s181_s1 = smov 16   ;;  %s182_s22 = smov 17   ;;  %123 = vmatpush.msra.mxu0 %v92_v2  ;;  %v91_v11 = vld [vmem:[%s311_s0 + $0x88] sm:$0xff]  ;;  %v88_v18 = vld [vmem:[%s311_s0 + $0x70] sm:$0xff]  ;;  %v89_v19 = vld [vmem:[%s311_s0 + $0x78] sm:$0xff] }
   0x4   :  { %143 = vmatpush.msra.mxu1 %v93_v3  ;;  %vm64_vm0 = vcmp.lt.s32.totalorder %v235_v8, 112  ;;  %vm71_vm1 = vcmp.lt.s32.totalorder %v235_v8, 111  ;;  %vm57_vm2 = vcmp.lt.s32.totalorder %v235_v8, 113  ;;  %v86_v24 = vld [vmem:[%s311_s0 + $0x60] sm:$0xff]  ;;  %v87_v25 = vld [vmem:[%s311_s0 + $0x68] sm:$0xff]  ;;  %vm50_vm3 = vcmp.lt.s32.totalorder %v235_v8, 127 }
   0x5   :  { %v84_v31 = vld [vmem:[%s311_s0 + $0x50] sm:$0xff]  ;;  %v85_v32 = vld [vmem:[%s311_s0 + $0x58] sm:$0xff]  ;;  %v82_v33 = vld [vmem:[%s311_s0 + $0x40] sm:$0xff]  ;;  %vm43_vm4 = vcmp.lt.s32.totalorder %v235_v8, 1  ;;  %vm36_vm5 = vcmp.lt.s32.totalorder %v235_v8, 15  ;;  %vm29_vm6 = vcmp.lt.s32.totalorder %v235_v8, 16 }
   0x6   :  { %v83_v34 = vld [vmem:[%s311_s0 + $0x48] sm:$0xff]  ;;  %v102_v41 = vmul.f32 %v82_v33, %v206_v0  ;;  %v80_v43 = vld [vmem:[%s311_s0 + $0x30] sm:$0xff]  ;;  %v81_v45 = vld [vmem:[%s311_s0 + $0x38] sm:$0xff]  ;;  %vm22_vm7 = vcmp.lt.s32.totalorder %v235_v8, 17 }
   0x7   :  { %v103_v42 = vmul.f32 %v83_v34, %v214_v1  ;;  %v78_v46 = vld [vmem:[%s311_s0 + $0x20] sm:$0xff]  ;;  %v79_v47 = vld [vmem:[%s311_s0 + $0x28] sm:$0xff]  ;;  %v76_v58 = vld [vmem:[%s311_s0 + $0x10] sm:$0xff] }
   0x8   :  { %v77_v59 = vld [vmem:[%s311_s0 + $0x18] sm:$0xff]  ;;  %v74_v3 = vld [vmem:[%s311_s0] sm:$0xff] }
   0xa   :  { %62 = vrot.lane.b32.xlu1 %v214_v1, %s175_s14  ;;  %69 = vrot.lane.b32.xlu0 %v214_v1, %s176_s15 }
   0xb   :  { %55 = vrot.lane.b32.xlu2 %v214_v1, %s177_s16 }
  0x12   :  { %48 = vrot.lane.b32.xlu1 %v214_v1, %s178_s19  ;;  %46 = vrot.lane.b32.xlu0 %v206_v0, %s178_s19 }
  0x13   :  { %39 = vrot.lane.b32.xlu2 %v206_v0, %s179_s20 }
  0x1a   :  { %32 = vrot.lane.b32.xlu1 %v206_v0, %s180_s21  ;;  %41 = vrot.lane.b32.xlu0 %v214_v1, %s179_s20 }
  0x1b   :  { %34 = vrot.lane.b32.xlu2 %v214_v1, %s180_s21 }
  0x22   :  { %27 = vrot.lane.b32.xlu1 %v214_v1, %s181_s1  ;;  %25 = vrot.lane.b32.xlu0 %v206_v0, %s181_s1 }
  0x23   :  { %16 = vrot.lane.b32.xlu2 %v206_v0, %s182_s22 }
  0x2a   :  { %18 = vrot.lane.b32.xlu0 %v214_v1, %s182_s22 }
  0x5d   :  { %v54_v4 = vpop.permute.xlu2 %53 }
  0x65   :  { %v56_v9 = vpop.permute.xlu2 %55 }
  0x66   :  { %v58_v22 = vsel %vm57_vm2, %v54_v4, %v56_v9  ;;  %v59_v23 = vsel %vm57_vm2, %v56_v9, %v54_v4  ;;  %v75_v4 = vld [vmem:[%s311_s0 + $0x8] sm:$0xff] }
  0x67   :  { %v106_v29 = vmul.f32 %v86_v24, %v58_v22  ;;  %v107_v30 = vmul.f32 %v87_v25, %v59_v23 }
  0x6d   :  { %v40_v28 = vpop.permute.xlu2 %39 }
  0x74   :  { %v61_v6 = vpop.permute.xlu1 %60  ;;  %v68_v7 = vpop.permute.xlu0 %67 }
  0x75   :  { %v35_v44 = vpop.permute.xlu2 %34 }
  0x7c   :  { %v63_v12 = vpop.permute.xlu1 %62  ;;  %v70_v13 = vpop.permute.xlu0 %69 }
  0x7d   :  { %v65_v14 = vsel %vm64_vm0, %v61_v6, %v63_v12  ;;  %v66_v15 = vsel %vm64_vm0, %v63_v12, %v61_v6  ;;  %v72_v16 = vsel %vm71_vm1, %v68_v7, %v70_v13  ;;  %v73_v17 = vsel %vm71_vm1, %v70_v13, %v68_v7  ;;  %v17_v2 = vpop.permute.xlu2 %16 }
  0x7e   :  { %v110_v20 = vmul.f32 %v90_v10, %v72_v16  ;;  %v111_v21 = vmul.f32 %v91_v11, %v73_v17  ;;  %v108_v26 = vmul.f32 %v88_v18, %v65_v14  ;;  %v109_v27 = vmul.f32 %v89_v19, %v66_v15  ;;  %v112_v11 = vld [vmem:[%s312_s2] sm:$0xff] }
  0x80   :  { %124 = vmatpush.msra.mxu0 %v110_v20  ;;  %144 = vmatpush.msra.mxu1 %v111_v21 }
  0x82   :  { %125 = vmatpush.msra.mxu0 %v108_v26  ;;  %145 = vmatpush.msra.mxu1 %v109_v27 }
  0x84   :  { %v49_v35 = vpop.permute.xlu1 %48  ;;  %v47_v36 = vpop.permute.xlu0 %46  ;;  %126 = vmatpush.msra.mxu0 %v106_v29  ;;  %146 = vmatpush.msra.mxu1 %v107_v30 }
  0x85   :  { %v51_v37 = vsel %vm50_vm3, %v47_v36, %v49_v35  ;;  %v52_v38 = vsel %vm50_vm3, %v49_v35, %v47_v36 }
  0x86   :  { %v104_v39 = vmul.f32 %v84_v31, %v51_v37  ;;  %v105_v40 = vmul.f32 %v85_v32, %v52_v38 }
  0x88   :  { %127 = vmatpush.msra.mxu0 %v104_v39  ;;  %147 = vmatpush.msra.mxu1 %v105_v40 }
  0x8a   :  { %128 = vmatpush.msra.mxu0 %v102_v41  ;;  %148 = vmatpush.msra.mxu1 %v103_v42 }
  0x8c   :  { %v33_v48 = vpop.permute.xlu1 %32  ;;  %v42_v49 = vpop.permute.xlu0 %41 }
  0x8d   :  { %v44_v50 = vsel %vm43_vm4, %v40_v28, %v42_v49  ;;  %v45_v51 = vsel %vm43_vm4, %v42_v49, %v40_v28  ;;  %v37_v52 = vsel %vm36_vm5, %v33_v48, %v35_v44  ;;  %v38_v53 = vsel %vm36_vm5, %v35_v44, %v33_v48 }
  0x8e   :  { %v100_v54 = vmul.f32 %v80_v43, %v45_v51  ;;  %v101_v55 = vmul.f32 %v81_v45, %v44_v50  ;;  %v98_v56 = vmul.f32 %v78_v46, %v38_v53  ;;  %v99_v57 = vmul.f32 %v79_v47, %v37_v52 }
  0x90   :  { %129 = vmatpush.msra.mxu0 %v100_v54  ;;  %149 = vmatpush.msra.mxu1 %v101_v55 }
  0x92   :  { %130 = vmatpush.msra.mxu0 %v98_v56  ;;  %150 = vmatpush.msra.mxu1 %v99_v57 }
  0x94   :  { %v28_v60 = vpop.permute.xlu1 %27  ;;  %v26_v61 = vpop.permute.xlu0 %25 }
  0x95   :  { %v30_v62 = vsel %vm29_vm6, %v26_v61, %v28_v60  ;;  %v31_v63 = vsel %vm29_vm6, %v28_v60, %v26_v61 }
  0x96   :  { %v96_v0 = vmul.f32 %v76_v58, %v31_v63  ;;  %v97_v1 = vmul.f32 %v77_v59, %v30_v62 }
  0x98   :  { %131 = vmatpush.msra.mxu0 %v96_v0  ;;  %151 = vmatpush.msra.mxu1 %v97_v1 }
  0x9c   :  { %v19_v5 = vpop.permute.xlu0 %18 }
  0x9d   :  { %v23_v6 = vsel %vm22_vm7, %v17_v2, %v19_v5  ;;  %v24_v7 = vsel %vm22_vm7, %v19_v5, %v17_v2 }
  0x9e   :  { %v94_v9 = vmul.f32 %v74_v3, %v24_v7  ;;  %v95_v10 = vmul.f32 %v75_v4, %v23_v6 }
  0xa0   :  { %132 = vmatpush.msra.mxu0 %v94_v9  ;;  %152 = vmatpush.msra.mxu1 %v95_v10 }
  0xa1   :  { %165 = vmatmul.msk.f32.vlgmr.msra.gmra.mxu0 %vm113_vm8, %v112_v11  ;;  %166 = vmatmul.msk.f32.vlgmr.msra.gmra.mxu1 %vm113_vm8, %v112_v11 }
 0x11e   :  { %v134_v8 = vpop.f32.mrf.mxu0  ;;  %v154_v12 = vpop.f32.mrf.mxu1 }
 0x11f   :  { %v157_v13 = vmax.f32 %v134_v8, 0.0  ;;  %v158_v14 = vmax.f32 %v154_v12, 0.0 }
 0x121   :  { %159 = vst [vmem:[%s313_s3] sm:$0xff] %v157_v13 }
 0x122   :  { %160 = vst [vmem:[%s313_s3 + $0x8] sm:$0xff] %v158_v14 }

</bundles_post_ra>
